<compile_context>
chip_gen: v6e
topology: v6e:2x2x1
jax: 0.10.0
libtpu: 0.0.40
codegen_flags: <defaults>
</compile_context>

<pallas_src>
import functools
import math

import jax
import jax.numpy as jnp
from jax.experimental import pallas as pl
from jax.experimental.pallas import tpu as pltpu


# ----------------------------------------------------------------------------
# cos/sin tables (interleaved, lane-dense layout)
# ----------------------------------------------------------------------------
def _rope_tables(d_model: int, seq_len: int, theta: float = 1000.0):
    """cos/sin tables in interleaved layout.

    Returns
      cos_dup:    (seq_len, d_model)  [c0,  c0,  c1,  c1,  ...]
      sin_signed: (seq_len, d_model)  [-s0, +s0, -s1, +s1, ...]
    """
    half = d_model // 2
    freqs = 1.0 / theta ** (
        jnp.arange(0, d_model, 2)[:half].astype(jnp.float32) / d_model)
    t = jnp.arange(seq_len, dtype=jnp.float32)
    angles = jnp.outer(t, freqs)                         # (S, half)
    cos = jnp.cos(angles)
    sin = jnp.sin(angles)
    cos_dup = jnp.repeat(cos, 2, axis=-1)                # (S, D)
    sin_signed = jnp.stack([-sin, sin], axis=-1).reshape(seq_len, d_model)
    return cos_dup, sin_signed


@functools.lru_cache(maxsize=None)
def _cached_tables(d_model: int, max_len: int):
    """Precompute the full tables once (persistent device buffers)."""
    cos, sin = _rope_tables(d_model, max_len)
    return jax.device_put(cos), jax.device_put(sin)


# ----------------------------------------------------------------------------
# kernel
# ----------------------------------------------------------------------------
def _rope_kernel(x_ref, cos_ref, sin_ref, o_ref):
    # x_ref / o_ref: (tB, tS, D) blocks; cos_ref / sin_ref: (tS, D) blocks,
    # shared across the folded batch entries (broadcast is free in-kernel).
    cos = cos_ref[...].astype(jnp.float32)
    sin = sin_ref[...].astype(jnp.float32)
    d = cos.shape[-1]
    # (1, D) lane-parity mask (cheap: D/128 vregs instead of tS*D/1024).
    lane = jax.lax.broadcasted_iota(jnp.int32, (1, d), dimension=1)
    even = (lane % 2) == 0
    for b in range(x_ref.shape[0]):          # static unroll over folded batch
        x = x_ref[b]                         # (tS, D), original dtype
        # Adjacent-pair swap in the interleaved layout (rolls on the un-cast
        # block -> half the XLU traffic for bf16 inputs):
        #   even lane 2k   <- x[2k+1],   odd lane 2k+1 <- x[2k]
        x_swap = jnp.where(even,
                           pltpu.roll(x, shift=d - 1, axis=1),
                           pltpu.roll(x, shift=1, axis=1))
        o_ref[b] = (x.astype(jnp.float32) * cos
                    + x_swap.astype(jnp.float32) * sin).astype(o_ref.dtype)


# ----------------------------------------------------------------------------
# tiling heuristics
# ----------------------------------------------------------------------------
def _pick_tiles(B, S, D, x_itemsize, table_itemsize):
    """Choose (batch_tile, seq_tile): blocks of ~1 MiB of x, inside the VMEM
    pipeline budget, with enough grid steps for pipelining / megacore."""
    min_rows = max(8, 32 // max(x_itemsize, 1))   # sublane-packing floor
    budget = 24 * 1024 * 1024                     # pipeline-buffer budget (all gens)
    target = 1 * 1024 * 1024                      # ~1 MiB of x per block

    row_bytes = D * x_itemsize
    # double-buffered x in + out, plus double-buffered cos/sin, per seq row
    pipe_row = 2 * (2 * row_bytes + 2 * D * table_itemsize)

    if S <= min_rows:
        ts = S
    else:
        cap_vmem = max(min_rows, budget // max(pipe_row, 1))
        cap_target = max(min_rows, target // max(row_bytes, 1))
        ns_min = -(-8 // max(B, 1))               # want >= ~8 total grid steps
        cap_steps = max(min_rows, -(-S // ns_min))
        ts = min(S, cap_vmem, cap_target, cap_steps)
        if ts < S:
            ts = max(min_rows, (ts // min_rows) * min_rows)
        ts = min(ts, S)

    # Fold batch rows into a block only when one block already covers all of S
    # (amortizes the ~0.35 us/step overhead and issues larger DMAs).
    tb = 1
    if ts == S and B > 1:
        block_bytes = ts * row_bytes
        want = max(1, target // max(block_bytes, 1))
        keep_steps = max(1, B // 8)               # keep >= ~8 steps when B allows
        tb = int(min(B, want, keep_steps, 8))     # cap static unroll at 8
        while tb > 1 and 2 * (2 * tb * block_bytes
                              + 2 * ts * D * table_itemsize) > budget:
            tb -= 1
    return tb, ts


def _vmem_limit_bytes():
    # Generation-aware: ~48 MiB on v7x (64 MiB/TC), up to 96 MiB on 128 MiB parts.
    try:
        cap = pltpu.get_tpu_info().vmem_capacity_bytes
    except Exception:
        cap = 64 * 1024 * 1024
    return int(min(96 * 1024 * 1024, max(32 * 1024 * 1024, cap * 3 // 4)))


# ----------------------------------------------------------------------------
# forward
# ----------------------------------------------------------------------------
@jax.jit
def _rope_apply(x, cos_full, sin_full):
    B, S, D = x.shape

    cos = jax.lax.slice_in_dim(cos_full, 0, S, axis=0)
    sin = jax.lax.slice_in_dim(sin_full, 0, S, axis=0)
    # Ship tables in x.dtype when x is sub-32-bit (halves table HBM traffic).
    table_dtype = x.dtype if x.dtype.itemsize < 4 else jnp.float32
    cos = cos.astype(table_dtype)
    sin = sin.astype(table_dtype)

    # Lane-dense flattening for D not a multiple of 128: (B, S, D) ->
    # (B, S/r, r*D).  The pair swap / parity mask is invariant under this
    # flattening (D even), and the tables reshape identically.
    r = 1
    if D % 128 != 0:
        r = 128 // math.gcd(D, 128)
        if S % r != 0:
            r = 1                       # fall back to masked stores for odd S
    if r > 1:
        xs, Ss, Ds = x.reshape(B, S // r, r * D), S // r, r * D
        cos = cos.reshape(Ss, Ds)
        sin = sin.reshape(Ss, Ds)
    else:
        xs, Ss, Ds = x, S, D

    tb, ts = _pick_tiles(B, Ss, Ds, x.dtype.itemsize,
                         jnp.dtype(table_dtype).itemsize)
    grid = (pl.cdiv(Ss, ts), pl.cdiv(B, tb))

    out = pl.pallas_call(
        _rope_kernel,
        out_shape=jax.ShapeDtypeStruct((B, Ss, Ds), x.dtype),
        grid_spec=pl.GridSpec(
            grid=grid,
            in_specs=[
                pl.BlockSpec((tb, ts, Ds), lambda s, b: (b, s, 0)),   # x
                pl.BlockSpec((ts, Ds), lambda s, b: (s, 0)),          # cos_dup
                pl.BlockSpec((ts, Ds), lambda s, b: (s, 0)),          # sin_signed
            ],
            out_specs=pl.BlockSpec((tb, ts, Ds), lambda s, b: (b, s, 0)),
        ),
        compiler_params=pltpu.CompilerParams(
            dimension_semantics=("parallel", "parallel"),
            vmem_limit_bytes=_vmem_limit_bytes(),
        ),
    )(xs, cos, sin)
    return out.reshape(B, S, D)


def rope_forward(x, max_len: int = 5000):
    """Pallas RoPE forward.  x: (B, S, D) with D even, S <= max_len."""
    B, S, D = x.shape
    assert D % 2 == 0, "d_model must be even for RoPE"
    assert S <= max_len, "sequence length exceeds max_len"
    cos_full, sin_full = _cached_tables(D, max_len)   # built once, like the buffer
    return _rope_apply(x, cos_full, sin_full)


# ----------------------------------------------------------------------------
# reference + tests
# ----------------------------------------------------------------------------
def _reference_rope(x):
    """Pure-JAX reference mirroring the PyTorch forward (de-interleaved path)."""
    B, S, D = x.shape
    half = D // 2
    theta = 1000.0
    freqs = 1.0 / theta ** (jnp.arange(0, D, 2)[:half].astype(jnp.float32) / D)
    t = jnp.arange(S, dtype=jnp.float32)
    ang = jnp.outer(t, freqs)
    c = jnp.cos(ang)[None]
    s = jnp.sin(ang)[None]
    xp = x.reshape(B, S, half, 2).astype(jnp.float32)
    xe, xo = xp[..., 0], xp[..., 1]
    oe = xe * c - xo * s
    oo = xe * s + xo * c
    return jnp.stack([oe, oo], axis=-1).reshape(B, S, D).astype(x.dtype)


if __name__ == "__main__":
    key = jax.random.PRNGKey(0)

    # Small shape: exercises the lane-dense flattening path (D=32 -> r=4, D'=128).
    B, S, D = 2, 8, 32
    x = jax.random.normal(key, (B, S, D), dtype=jnp.float32)
    out = jax.block_until_ready(rope_forward(x))
    ref = _reference_rope(x)
    assert out.shape == x.shape and out.dtype == x.dtype
    assert jnp.allclose(out, ref, atol=1e-5, rtol=1e-5)

    # Flattening with a longer sequence (S=24 -> S'=6, grid over batch).
    x2 = jax.random.normal(jax.random.PRNGKey(1), (2, 24, 32), dtype=jnp.float32)
    out2 = jax.block_until_ready(rope_forward(x2))
    ref2 = _reference_rope(x2)
    assert jnp.allclose(out2, ref2, atol=1e-5, rtol=1e-5)

    # Lane-dense D (128) with a ragged cdiv grid (S=20, tS=8 -> 3 tiles, last masked).
    x3 = jax.random.normal(jax.random.PRNGKey(2), (1, 20, 128), dtype=jnp.float32)
    out3 = jax.block_until_ready(rope_forward(x3))
    ref3 = _reference_rope(x3)
    assert jnp.allclose(out3, ref3, atol=1e-5, rtol=1e-5)

    print("KERNEL_OK")
</pallas_src>

<mosaic_0001>
module attributes {stable_mosaic.version = 11 : i64} {
  func.func @_rope_kernel(%arg0: i32, %arg1: i32, %arg2: memref<1x2x128xf32, #tpu.memory_space<vmem>>, %arg3: memref<2x128xf32, #tpu.memory_space<vmem>>, %arg4: memref<2x128xf32, #tpu.memory_space<vmem>>, %arg5: memref<1x2x128xf32, #tpu.memory_space<vmem>>) attributes {dimension_semantics = [#tpu.dimension_semantics<parallel>, #tpu.dimension_semantics<parallel>], iteration_bounds = array<i64: 1, 2>, scalar_prefetch = 0 : i64, scratch_operands = 0 : i64, tpu.core_type = #tpu.core_type<tc>, window_params = [{transform_indices = @transform_0, window_bounds = array<i64: 1, 2, 128>}, {transform_indices = @transform_1, window_bounds = array<i64: 2, 128>}, {transform_indices = @transform_2, window_bounds = array<i64: 2, 128>}, {transform_indices = @transform_3, window_bounds = array<i64: 1, 2, 128>}]} {
    %c0 = arith.constant 0 : index
    %c0_0 = arith.constant 0 : index
    %0 = vector.load %arg3[%c0, %c0_0] : memref<2x128xf32, #tpu.memory_space<vmem>>, vector<2x128xf32>
    %c0_1 = arith.constant 0 : index
    %c0_2 = arith.constant 0 : index
    %1 = vector.load %arg4[%c0_1, %c0_2] : memref<2x128xf32, #tpu.memory_space<vmem>>, vector<2x128xf32>
    %2 = tpu.iota {dimensions = array<i32: 1>} : vector<1x128xi32>
    %c2_i32 = arith.constant 2 : i32
    %c0_i32 = arith.constant 0 : i32
    %3 = arith.cmpi eq, %c2_i32, %c0_i32 : i32
    %c1_i32 = arith.constant 1 : i32
    %4 = arith.select %3, %c1_i32, %c2_i32 : i32
    %5 = vector.broadcast %4 : i32 to vector<1x128xi32>
    %6 = arith.remsi %2, %5 : vector<1x128xi32>
    %c0_i32_3 = arith.constant 0 : i32
    %7 = vector.broadcast %c0_i32_3 : i32 to vector<1x128xi32>
    %8 = arith.cmpi ne, %6, %7 : vector<1x128xi32>
    %c0_i32_4 = arith.constant 0 : i32
    %9 = vector.broadcast %c0_i32_4 : i32 to vector<1x128xi32>
    %10 = arith.cmpi slt, %6, %9 : vector<1x128xi32>
    %c0_i32_5 = arith.constant 0 : i32
    %11 = arith.cmpi slt, %4, %c0_i32_5 : i32
    %12 = vector.broadcast %11 : i1 to vector<1x128xi1>
    %13 = vector.broadcast %12 : vector<1x128xi1> to vector<1x128xi1>
    %14 = arith.xori %10, %13 : vector<1x128xi1>
    %15 = arith.andi %14, %8 : vector<1x128xi1>
    %16 = vector.broadcast %4 : i32 to vector<1x128xi32>
    %17 = arith.addi %6, %16 : vector<1x128xi32>
    %18 = arith.select %15, %17, %6 : vector<1x128xi1>, vector<1x128xi32>
    %c0_i32_6 = arith.constant 0 : i32
    %19 = vector.broadcast %c0_i32_6 : i32 to vector<1x128xi32>
    %20 = arith.cmpi eq, %18, %19 : vector<1x128xi32>
    %c0_7 = arith.constant 0 : index
    %c0_8 = arith.constant 0 : index
    %c0_9 = arith.constant 0 : index
    %21 = vector.load %arg2[%c0_7, %c0_8, %c0_9] : memref<1x2x128xf32, #tpu.memory_space<vmem>>, vector<1x2x128xf32>
    %22 = vector.shape_cast %21 : vector<1x2x128xf32> to vector<2x128xf32>
    %c127_i32 = arith.constant 127 : i32
    %23 = tpu.dynamic_rotate %22 by %c127_i32 dim 1 : vector<2x128xf32>, i32 -> vector<2x128xf32>
    %c1_i32_10 = arith.constant 1 : i32
    %24 = tpu.dynamic_rotate %22 by %c1_i32_10 dim 1 : vector<2x128xf32>, i32 -> vector<2x128xf32>
    %25 = vector.shape_cast %20 : vector<1x128xi1> to vector<1x128xi1>
    %26 = vector.broadcast %25 : vector<1x128xi1> to vector<2x128xi1>
    %27 = arith.select %26, %23, %24 : vector<2x128xi1>, vector<2x128xf32>
    %28 = arith.mulf %22, %0 : vector<2x128xf32>
    %29 = arith.mulf %27, %1 : vector<2x128xf32>
    %30 = arith.addf %28, %29 : vector<2x128xf32>
    %c0_11 = arith.constant 0 : index
    %c0_12 = arith.constant 0 : index
    %c0_13 = arith.constant 0 : index
    %31 = vector.load %arg5[%c0_11, %c0_12, %c0_13] : memref<1x2x128xf32, #tpu.memory_space<vmem>>, vector<1x2x128xf32>
    %32 = vector.shape_cast %31 : vector<1x2x128xf32> to vector<2x128xf32>
    %33 = vector.shape_cast %30 : vector<2x128xf32> to vector<1x2x128xf32>
    tpu.vector_store %arg5[%c0_11, %c0_12, %c0_13], %33 {strides = array<i32>} : memref<1x2x128xf32, #tpu.memory_space<vmem>>, vector<1x2x128xf32>,
    return
  }
  func.func @transform_0(%arg0: i32, %arg1: i32) -> (i32, i32, i32) {
    %c0_i32 = arith.constant 0 : i32
    %c0_i32_0 = arith.constant 0 : i32
    return %arg1, %arg0, %c0_i32 : i32, i32, i32
  }
  func.func @transform_1(%arg0: i32, %arg1: i32) -> (i32, i32) {
    %c0_i32 = arith.constant 0 : i32
    %c0_i32_0 = arith.constant 0 : i32
    return %arg0, %c0_i32 : i32, i32
  }
  func.func @transform_2(%arg0: i32, %arg1: i32) -> (i32, i32) {
    %c0_i32 = arith.constant 0 : i32
    %c0_i32_0 = arith.constant 0 : i32
    return %arg0, %c0_i32 : i32, i32
  }
  func.func @transform_3(%arg0: i32, %arg1: i32) -> (i32, i32, i32) {
    %c0_i32 = arith.constant 0 : i32
    %c0_i32_0 = arith.constant 0 : i32
    return %arg1, %arg0, %c0_i32 : i32, i32, i32
  }
}

</mosaic_0001>

<bundles_post_ra>
// kernel: _rope_apply.1
= control target key start
LH: loop header
LB: loop body
LE: loop exit
PB: predicated region body
PF: predicated region fallthrough
CT: control target
= control target key end

     0   :  { %s448_s12 = smov 0   ;;  %s450_s13 = smov 0   ;;  %s487_s0 = inlined_call_operand.vmem [shape: f32[2,2,128], index: 0, kind: input, shape index: {}]   ;;  %s488_s1 = inlined_call_operand.vmem [shape: f32[2,128], index: 1, kind: input, shape index: {}]   ;;  %s489_s2 = inlined_call_operand.vmem [shape: f32[2,128], index: 2, kind: input, shape index: {}]   ;;  %s490_s3 = inlined_call_operand.vmem [shape: f32[2,2,128], index: 3, kind: output, shape index: {}]  }
   0x1   :  { %s452_s14 = smov 0  }
   0x2 LB: > { %s22_s15 = sadd.s32 1, %s420_s13  ;;  %p371_p0 = scmp.ge.s32.totalorder %s424_s14, 1  ;;  %s424_s14 = sphi %s452_s14, %s13_s14   ;;  %s420_s13 = sphi %s450_s13, %s492_s13   ;;  %s416_s12 = sphi %s448_s12, %s491_s12  }
   0x3   : > { %p23_p1 = scmp.ge.s32.totalorder %s22_s15, 2  ;;  %p173_p2 = scmp.lt.s32.totalorder %s424_s14, 3 }
   0x5   : > { %s494_s15 = smov (%p23_p1, %s22_s15), 0  ;;  %p174_p3 = pnand %p371_p0, %p173_p2 }
   0x6   : > { %p209_p4 = scmp.lt.s32.totalorder (!%p174_p3), %s416_s12, 1  ;;  %s426_s20 = smov (!%p174_p3), 127  }
   0x7   : > { %177 = sbr.rel (%p174_p3) target bundleno = 141 (0x8d), region = 32  ;;  %s427_s21 = smov (!%p174_p3), 1  }
   0xc   : > { %s496_s12 = smov (!%p209_p4, %s416_s12), 1  ;;  %v233_v1 = vlaneseq  ;;  %v231_v5 = vld [vmem:[%s488_s1] sm:$0x3] }
   0xd   : > { %s372_s16 = sshll.u32 %s496_s12, 1  ;;  %v232_v6 = vld [vmem:[%s489_s2] sm:$0x3] }
   0xe   : > { %s215_s19 = scalar_lea.vmem %s487_s0, %s372_s16  ;;  %v234_v2 = vand.u32 127, %v233_v1  ;;  %s230_s28 = scalar_lea.vmem %s490_s3, %s372_s16 }
   0xf   : > { %v248_v0 = vld [vmem:[%s215_s19] sm:$0x3] }
  0x10   : > { %249 = vrot.lane.b32.xlu0 %v248_v0, %s426_s20  ;;  %v239_v3 = vand.u32 1, %v234_v2  ;;  %v256_v7 = vmul.f32 %v248_v0, %v231_v5 }
  0x12   : > { %vm247_vm0 = vcmp.eq.s32.totalorder %v239_v3, 0 }
  0x14   : > { %251 = vrot.lane.b32.xlu0 %v248_v0, %s427_s21 }
  0x82   : > { %v250_v4 = vpop.permute.xlu0 %249 }
  0x86   : > { %v252_v8 = vpop.permute.xlu0 %251 }
  0x87   : > { %v255_v9 = vsel %vm247_vm0, %v250_v4, %v252_v8 }
  0x88   : > { %v257_v10 = vmul.f32 %v255_v9, %v232_v6 }
  0x8a   : > { %v258_v11 = vadd.f32 %v257_v10, %v256_v7 }
  0x8c   : > { %259 = vst [vmem:[%s230_s28] sm:$0x3] %v258_v11 }
  0x8d PF: > { %s13_s14 = sadd.s32 1, %s424_s14   ;;  %s491_s12 = smov %s420_s13 }
  0x8e   : > { %p10_p5 = scmp.ge.s32.totalorder %s13_s14, 4   ;;  %s492_s13 = smov %s494_s15 }
  0x90   :  { %12 = sbr.rel (!%p10_p5) target bundleno = 2 (0x2), region = 68 }

</bundles_post_ra>
